<compile_context>
chip_gen: v6e
topology: v6e:2x2x1
jax: 0.10.0
libtpu: 0.0.40
codegen_flags: <defaults>
</compile_context>

<pallas_src>
import jax
import jax.numpy as jnp
from jax.experimental import pallas as pl
from jax.experimental.pallas import tpu as pltpu

SH_DEGREE = 0
IMG_CHANNEL = 3 + 1 + 4 + 3 + 3 * (SH_DEGREE + 1) ** 2  # = 14


def _brightdreamer_kernel(anchor_t_ref, txt_bias_ref, wpos_t_ref, w2_t_ref, b2_ref,
                          out_ref):
    """One (batch b, anchor-column-tile i) step, fully channels-first / lane-dense.

    anchor_t_ref : (3, tile_n)       anchor positions, transposed
    txt_bias_ref : (1, H, 1)         per-batch text bias (txt @ W_txt + b1)
    wpos_t_ref   : (H, 3)            W_pos^T
    w2_t_ref     : (C, H)            W2^T
    b2_ref       : (C, 1)
    out_ref      : (1, C, tile_n)    raw gaussian properties, channels-first
    """
    pos_t = anchor_t_ref[...]                                             # (3, tile_n)

    # Generator stand-in: hidden = relu(Wp^T @ pos_t + txt_bias); raw = W2^T @ hidden + b2
    h = jnp.dot(wpos_t_ref[...], pos_t, preferred_element_type=jnp.float32)   # (H, tile_n)
    h = jnp.maximum(h + txt_bias_ref[0], 0.0)                                 # + (H, 1)
    raw = jnp.dot(w2_t_ref[...], h, preferred_element_type=jnp.float32)       # (C, tile_n)
    raw = raw + b2_ref[...]                                                   # + (C, 1)

    # gaussian_generate post-processing (channel == sublane row, fused):
    #   scaling (rows  8..10):  6 * sigmoid(x) - 9
    #   f_dc    (rows 11..13):  3.545 * sigmoid(x) - 1.7725
    #   everything else passes through (xyz, opacity, rotation).
    sig = jax.nn.sigmoid(raw)
    row = jax.lax.broadcasted_iota(jnp.int32, raw.shape, 0)
    out = jnp.where((row >= 8) & (row < 11), 6.0 * sig - 9.0,
                    jnp.where((row >= 11) & (row < 14), 3.545 * sig - 1.7725, raw))

    out_ref[0] = out.astype(out_ref.dtype)


def brightdreamer_gaussian_generate(text_zs, anchor, params, *, tile_n=2048):
    """Returns gaussian properties, channels-first: (B, IMG_CHANNEL, N) float32."""
    B = text_zs.shape[0]
    N = anchor.shape[0]
    assert N % tile_n == 0, "anchor count must be divisible by tile_n"
    assert tile_n % 128 == 0, "tile_n must be a multiple of 128 (lane width)"
    H = params["w_pos"].shape[-1]
    C = IMG_CHANNEL

    # glue (hoisted out of the kernel): pool tokens, fold text contribution + b1
    # into a per-batch hidden-layer bias.
    txt_pooled = jnp.mean(text_zs.astype(jnp.float32), axis=1)                 # (B, D)
    txt_bias = (txt_pooled @ params["w_txt"] + params["b1"])[..., None]        # (B, H, 1)

    # static layout plumbing (done once, outside the kernel)
    anchor_t = anchor.T                                                        # (3, N)
    wpos_t = params["w_pos"].T                                                 # (H, 3)
    w2_t = params["w2"].T                                                      # (C, H)
    b2 = params["b2"].reshape(C, 1)                                            # (C, 1)

    grid = (B, N // tile_n)
    out_cf = pl.pallas_call(
        _brightdreamer_kernel,
        out_shape=jax.ShapeDtypeStruct((B, C, N), jnp.float32),
        grid_spec=pltpu.PrefetchScalarGridSpec(
            num_scalar_prefetch=0,
            grid=grid,
            in_specs=[
                pl.BlockSpec((3, tile_n), lambda b, i: (0, i)),    # anchor^T columns
                pl.BlockSpec((1, H, 1), lambda b, i: (b, 0, 0)),   # per-batch text bias
                pl.BlockSpec((H, 3), lambda b, i: (0, 0)),         # W_pos^T (full)
                pl.BlockSpec((C, H), lambda b, i: (0, 0)),         # W2^T    (full)
                pl.BlockSpec((C, 1), lambda b, i: (0, 0)),         # b2      (full)
            ],
            out_specs=pl.BlockSpec((1, C, tile_n), lambda b, i: (b, 0, i)),
        ),
        compiler_params=pltpu.CompilerParams(
            dimension_semantics=("parallel", "parallel")),
    )(anchor_t, txt_bias, wpos_t, w2_t, b2)
    return out_cf  # (B, C, N)


def brightdreamer_forward(text_zs, anchor, params, *, tile_n=2048):
    """Mirrors BrightDreamer.forward up to (and excluding) the CUDA rasterizer."""
    props_cf = brightdreamer_gaussian_generate(text_zs, anchor, params, tile_n=tile_n)
    # channels-last view for downstream consumers (single XLA transpose, outside kernel)
    props = jnp.transpose(props_cf, (0, 2, 1))                     # (B, N, C)
    B = props.shape[0]
    gaussians = []
    for i in range(B):  # glue: split channels into GaussianModel fields
        p = props[i]
        gaussians.append({
            "_xyz":           p[:, 0:3],
            "_opacity":       p[:, 3:4],
            "_rotation":      p[:, 4:8],
            "_scaling":       p[:, 8:11],                      # transform fused in kernel
            "_features_dc":   p[:, 11:14].reshape(-1, 1, 3),   # transform fused in kernel
            "_features_rest": p[:, 14:].reshape(-1, 15, 3),    # empty for sh_degree=0
        })
    # TODO(synk): `render(view, gaussian, ...)` (Gaussian-splatting rasterizer) omitted.
    return {"gaussians": gaussians, "gaussians_property": props}


def make_anchor_position(grid_resolution=64, bound=1.0):
    """torch.meshgrid(indexing='ij') of arange(-bound, bound, 2*bound/res), stacked & flattened."""
    ax = jnp.arange(-bound, bound, bound * 2.0 / grid_resolution, dtype=jnp.float32)
    gx, gy, gz = jnp.meshgrid(ax, ax, ax, indexing="ij")
    return jnp.stack([gx, gy, gz], axis=3).reshape(-1, 3)


def init_params(key, text_dim=32, hidden=32):
    k1, k2, k3, k4, k5 = jax.random.split(key, 5)
    return {
        "w_pos": 0.1 * jax.random.normal(k1, (3, hidden), jnp.float32),
        "w_txt": 0.1 * jax.random.normal(k2, (text_dim, hidden), jnp.float32),
        "b1":    0.01 * jax.random.normal(k3, (1, hidden), jnp.float32),
        "w2":    0.1 * jax.random.normal(k4, (hidden, IMG_CHANNEL), jnp.float32),
        "b2":    0.01 * jax.random.normal(k5, (1, IMG_CHANNEL), jnp.float32),
    }


if __name__ == "__main__":
    key = jax.random.PRNGKey(0)
    k_par, k_txt = jax.random.split(key)

    # Small demo shapes (module default grid_resolution=64 -> N=262144; use 16 -> N=4096 here).
    B, L, D, H = 2, 8, 32, 32
    grid_res = 16

    anchor = make_anchor_position(grid_resolution=grid_res, bound=1.0)   # (4096, 3)
    params = init_params(k_par, text_dim=D, hidden=H)
    text_zs = jax.random.normal(k_txt, (B, L, D), jnp.float32)

    out = brightdreamer_forward(text_zs, anchor, params, tile_n=2048)
    jax.block_until_ready(out["gaussians_property"])

    # Light sanity checks on shapes / fused transform ranges.
    props = out["gaussians_property"]
    assert props.shape == (B, grid_res ** 3, IMG_CHANNEL)
    g0 = out["gaussians"][0]
    assert g0["_xyz"].shape == (grid_res ** 3, 3)
    assert g0["_features_dc"].shape == (grid_res ** 3, 1, 3)
    assert bool(jnp.all(g0["_scaling"] > -9.0)) and bool(jnp.all(g0["_scaling"] < -3.0))
    assert bool(jnp.all(jnp.abs(g0["_features_dc"]) < 1.7725 + 1e-4))

    print("KERNEL_OK")
</pallas_src>

<mosaic_0001>
module attributes {stable_mosaic.version = 11 : i64} {
  func.func @_brightdreamer_kernel(%arg0: i32, %arg1: i32, %arg2: memref<3x2048xf32, #tpu.memory_space<vmem>>, %arg3: memref<1x32x1xf32, #tpu.memory_space<vmem>>, %arg4: memref<32x3xf32, #tpu.memory_space<vmem>>, %arg5: memref<14x32xf32, #tpu.memory_space<vmem>>, %arg6: memref<14x1xf32, #tpu.memory_space<vmem>>, %arg7: memref<1x14x2048xf32, #tpu.memory_space<vmem>>) attributes {dimension_semantics = [#tpu.dimension_semantics<parallel>, #tpu.dimension_semantics<parallel>], iteration_bounds = array<i64: 2, 2>, scalar_prefetch = 0 : i64, scratch_operands = 0 : i64, tpu.core_type = #tpu.core_type<tc>, window_params = [{transform_indices = @transform_0, window_bounds = array<i64: 3, 2048>}, {transform_indices = @transform_1, window_bounds = array<i64: 1, 32, 1>}, {pipeline_mode = #tpu.pipeline_mode<synchronous>, transform_indices = @transform_2, window_bounds = array<i64: 32, 3>}, {pipeline_mode = #tpu.pipeline_mode<synchronous>, transform_indices = @transform_3, window_bounds = array<i64: 14, 32>}, {pipeline_mode = #tpu.pipeline_mode<synchronous>, transform_indices = @transform_4, window_bounds = array<i64: 14, 1>}, {transform_indices = @transform_5, window_bounds = array<i64: 1, 14, 2048>}]} {
    %c0 = arith.constant 0 : index
    %c0_0 = arith.constant 0 : index
    %0 = vector.load %arg2[%c0, %c0_0] : memref<3x2048xf32, #tpu.memory_space<vmem>>, vector<3x2048xf32>
    %c0_1 = arith.constant 0 : index
    %c0_2 = arith.constant 0 : index
    %1 = vector.load %arg4[%c0_1, %c0_2] : memref<32x3xf32, #tpu.memory_space<vmem>>, vector<32x3xf32>
    %cst = arith.constant dense<0.000000e+00> : vector<32x2048xf32>
    %2 = tpu.matmul %1, %0, %cst {dimension_numbers = #tpu.dot_dimension_numbers<[1], [0], [0], [1], [0, 0, 1, 1], [], []>} : vector<32x3xf32>, vector<3x2048xf32>, vector<32x2048xf32> -> vector<32x2048xf32>
    %c0_3 = arith.constant 0 : index
    %c0_4 = arith.constant 0 : index
    %c0_5 = arith.constant 0 : index
    %3 = vector.load %arg3[%c0_3, %c0_4, %c0_5] : memref<1x32x1xf32, #tpu.memory_space<vmem>>, vector<1x32x1xf32>
    %4 = vector.shape_cast %3 : vector<1x32x1xf32> to vector<32x1xf32>
    %5 = vector.broadcast %4 : vector<32x1xf32> to vector<32x2048xf32>
    %6 = arith.addf %2, %5 : vector<32x2048xf32>
    %cst_6 = arith.constant 0.000000e+00 : f32
    %7 = vector.broadcast %cst_6 : f32 to vector<32x2048xf32>
    %8 = arith.maximumf %6, %7 : vector<32x2048xf32>
    %c0_7 = arith.constant 0 : index
    %c0_8 = arith.constant 0 : index
    %9 = vector.load %arg5[%c0_7, %c0_8] : memref<14x32xf32, #tpu.memory_space<vmem>>, vector<14x32xf32>
    %cst_9 = arith.constant dense<0.000000e+00> : vector<14x2048xf32>
    %10 = tpu.matmul %9, %8, %cst_9 {dimension_numbers = #tpu.dot_dimension_numbers<[1], [0], [0], [1], [0, 0, 1, 1], [], []>} : vector<14x32xf32>, vector<32x2048xf32>, vector<14x2048xf32> -> vector<14x2048xf32>
    %c0_10 = arith.constant 0 : index
    %c0_11 = arith.constant 0 : index
    %11 = vector.load %arg6[%c0_10, %c0_11] : memref<14x1xf32, #tpu.memory_space<vmem>>, vector<14x1xf32>
    %12 = vector.broadcast %11 : vector<14x1xf32> to vector<14x2048xf32>
    %13 = arith.addf %10, %12 : vector<14x2048xf32>
    %14 = arith.negf %13 : vector<14x2048xf32>
    %15 = math.exp %14 : vector<14x2048xf32>
    %cst_12 = arith.constant 1.000000e+00 : f32
    %16 = vector.broadcast %cst_12 : f32 to vector<14x2048xf32>
    %17 = arith.addf %16, %15 : vector<14x2048xf32>
    %18 = arith.divf %16, %17 : vector<14x2048xf32>
    %19 = tpu.iota {dimensions = array<i32: 0>} : vector<14x2048xi32>
    %c8_i32 = arith.constant 8 : i32
    %20 = vector.broadcast %c8_i32 : i32 to vector<14x2048xi32>
    %21 = arith.cmpi sge, %19, %20 : vector<14x2048xi32>
    %c11_i32 = arith.constant 11 : i32
    %22 = vector.broadcast %c11_i32 : i32 to vector<14x2048xi32>
    %23 = arith.cmpi slt, %19, %22 : vector<14x2048xi32>
    %24 = arith.andi %21, %23 : vector<14x2048xi1>
    %cst_13 = arith.constant 6.000000e+00 : f32
    %25 = vector.broadcast %cst_13 : f32 to vector<14x2048xf32>
    %26 = arith.mulf %25, %18 : vector<14x2048xf32>
    %cst_14 = arith.constant 9.000000e+00 : f32
    %27 = vector.broadcast %cst_14 : f32 to vector<14x2048xf32>
    %28 = arith.subf %26, %27 : vector<14x2048xf32>
    %c11_i32_15 = arith.constant 11 : i32
    %29 = vector.broadcast %c11_i32_15 : i32 to vector<14x2048xi32>
    %30 = arith.cmpi sge, %19, %29 : vector<14x2048xi32>
    %c14_i32 = arith.constant 14 : i32
    %31 = vector.broadcast %c14_i32 : i32 to vector<14x2048xi32>
    %32 = arith.cmpi slt, %19, %31 : vector<14x2048xi32>
    %33 = arith.andi %30, %32 : vector<14x2048xi1>
    %cst_16 = arith.constant 3.545000e+00 : f32
    %34 = vector.broadcast %cst_16 : f32 to vector<14x2048xf32>
    %35 = arith.mulf %34, %18 : vector<14x2048xf32>
    %cst_17 = arith.constant 1.772500e+00 : f32
    %36 = vector.broadcast %cst_17 : f32 to vector<14x2048xf32>
    %37 = arith.subf %35, %36 : vector<14x2048xf32>
    %38 = arith.select %33, %37, %13 : vector<14x2048xi1>, vector<14x2048xf32>
    %39 = arith.select %24, %28, %38 : vector<14x2048xi1>, vector<14x2048xf32>
    %c0_18 = arith.constant 0 : index
    %c0_19 = arith.constant 0 : index
    %c0_20 = arith.constant 0 : index
    %40 = vector.load %arg7[%c0_18, %c0_19, %c0_20] : memref<1x14x2048xf32, #tpu.memory_space<vmem>>, vector<1x14x2048xf32>
    %41 = vector.shape_cast %40 : vector<1x14x2048xf32> to vector<14x2048xf32>
    %42 = vector.shape_cast %39 : vector<14x2048xf32> to vector<1x14x2048xf32>
    tpu.vector_store %arg7[%c0_18, %c0_19, %c0_20], %42 {strides = array<i32>} : memref<1x14x2048xf32, #tpu.memory_space<vmem>>, vector<1x14x2048xf32>,
    return
  }
  func.func @transform_0(%arg0: i32, %arg1: i32) -> (i32, i32) {
    %c0_i32 = arith.constant 0 : i32
    %c0_i32_0 = arith.constant 0 : i32
    return %c0_i32, %arg1 : i32, i32
  }
  func.func @transform_1(%arg0: i32, %arg1: i32) -> (i32, i32, i32) {
    %c0_i32 = arith.constant 0 : i32
    %c0_i32_0 = arith.constant 0 : i32
    %c0_i32_1 = arith.constant 0 : i32
    return %arg0, %c0_i32, %c0_i32_0 : i32, i32, i32
  }
  func.func @transform_2(%arg0: i32, %arg1: i32) -> (i32, i32) {
    %c0_i32 = arith.constant 0 : i32
    %c0_i32_0 = arith.constant 0 : i32
    %c0_i32_1 = arith.constant 0 : i32
    return %c0_i32, %c0_i32_0 : i32, i32
  }
  func.func @transform_3(%arg0: i32, %arg1: i32) -> (i32, i32) {
    %c0_i32 = arith.constant 0 : i32
    %c0_i32_0 = arith.constant 0 : i32
    %c0_i32_1 = arith.constant 0 : i32
    return %c0_i32, %c0_i32_0 : i32, i32
  }
  func.func @transform_4(%arg0: i32, %arg1: i32) -> (i32, i32) {
    %c0_i32 = arith.constant 0 : i32
    %c0_i32_0 = arith.constant 0 : i32
    %c0_i32_1 = arith.constant 0 : i32
    return %c0_i32, %c0_i32_0 : i32, i32
  }
  func.func @transform_5(%arg0: i32, %arg1: i32) -> (i32, i32, i32) {
    %c0_i32 = arith.constant 0 : i32
    %c0_i32_0 = arith.constant 0 : i32
    return %arg0, %c0_i32, %arg1 : i32, i32, i32
  }
}

</mosaic_0001>

<bundles_post_ra>
// kernel: tpu_custom_call.1
= control target key start
LH: loop header
LB: loop body
LE: loop exit
PB: predicated region body
PF: predicated region fallthrough
CT: control target
= control target key end

     0   :  { %10 = vsyncpa [#allocation3], 0  ;;  %s3627_s0 = inlined_call_operand.hbm [shape: f32[3,4096], index: 0, kind: input, shape index: {}]   ;;  %s3628_s1 = inlined_call_operand.vmem [shape: f32[2,32,1], index: 1, kind: input, shape index: {}]   ;;  %s3629_s2 = inlined_call_operand.vmem [shape: f32[32,3], index: 2, kind: input, shape index: {}]   ;;  %s3630_s3 = inlined_call_operand.vmem [shape: f32[14,32], index: 3, kind: input, shape index: {}]   ;;  %s3631_s4 = inlined_call_operand.vmem [shape: f32[14,1], index: 4, kind: input, shape index: {}]   ;;  %s3632_s5 = inlined_call_operand.vmem [shape: f32[2,14,4096], index: 5, kind: output, shape index: {}]  }
   0x1   :  { %12 = vsyncpa [#allocation3 + $0x1], 0  ;;  %s2882_s18 = smov 0   ;;  %s2884_s19 = smov 0  }
   0x2   :  { %s2886_s20 = smov 0   ;;  %s2888_s21 = smov 0  }
   0x3   :  { %s2890_s22 = smov 0   ;;  %s2892_s23 = smov 0  }
   0x4   :  { %s2894_s24 = smov 0   ;;  %s2896_s25 = smov 0  }
   0x5   :  { %s2898_s26 = smov 0   ;;  %s2900_s27 = smov 0  }
   0x6 LB: > { %s2394_s28 = sadd.s32 4294967295, %s2847_s27   ;;  %s27_s29 = sadd.s32 1, %s2839_s25  ;;  %s2847_s27 = sphi %s2900_s27, %s18_s27   ;;  %s2843_s26 = sphi %s2898_s26, %s3653_s26   ;;  %s2839_s25 = sphi %s2896_s25, %s3652_s25   ;;  %s2835_s24 = sphi %s2894_s24, %s3651_s24   ;;  %s2831_s23 = sphi %s2892_s23, %s3650_s23   ;;  %s2827_s22 = sphi %s2890_s22, %s3649_s22   ;;  %s2823_s21 = sphi %s2888_s21, %s3648_s21   ;;  %s2819_s20 = sphi %s2886_s20, %s3647_s20   ;;  %s2815_s19 = sphi %s2884_s19, %s3646_s19   ;;  %s2811_s18 = sphi %s2882_s18, %s3645_s18  }
   0x7   : > { %p28_p0 = scmp.ge.s32.totalorder %s27_s29, 2  ;;  %s30_s30 = sadd.s32 1, %s2843_s26 }
   0x8   : > { %s37_s6 = sadd.s32 1, %s2827_s22  ;;  %p44_p1 = scmp.ne.s32.totalorder %s2827_s22, %s2823_s21 }
   0x9   : > { %s3655_s29 = smov (%p28_p0, %s27_s29), 0  ;;  %s3657_s30 = smov (!%p28_p0, %s30_s30), %s2843_s26 }
   0xa   : > { %3635 = sst [smem:[#allocation6_spill]] %s3655_s29  ;;  %s34_s7 = ssub.s32 %s2839_s25, %s3655_s29 }
   0xb   : > { %p45_p2 = scmp.eq.s32.totalorder %s2847_s27, 0  ;;  %p32_p3 = scmp.ge.s32.totalorder %s3657_s30, 2 }
   0xc   : > { %p35_p4 = scmp.eq.s32.totalorder %s34_s7, 0  ;;  %p50_p6 = scmp.ne.s32.totalorder %s2823_s21, %s2819_s20 }
   0xd   : > { %p2942_p5 = por %p45_p2, %p44_p1  ;;  %s3659_s30 = smov (%p32_p3, %s3657_s30), 0 }
   0xe   : > { %3637 = sst [smem:[#allocation7_spill]] %s3659_s30  ;;  %p51_p7 = scmp.eq.s32.totalorder %s2394_s28, 0 }
   0xf   : > { %s2950_s9 = scalar_select %p35_p4, %s2827_s22, %s37_s6  }
  0x10   : > { %s149_s10 = ssub.s32 %s2843_s26, %s3659_s30  ;;  %s154_s12 = sadd.s32 1, %s2815_s19 }
  0x11   : > { %s151_s11 = sor.u32 %s149_s10, %s34_s7  ;;  %p2955_p8 = por %p51_p7, %p50_p6 }
  0x12   : > { %p152_p9 = scmp.eq.s32.totalorder %s151_s11, 0  ;;  %p164_p10 = scmp.ne.s32.totalorder %s2815_s19, %s2811_s18 }
  0x13   : > { %p165_p11 = scmp.eq.s32.totalorder %s2394_s28, 3  ;;  %p2580_p13 = scmp.lt.s32.totalorder %s2847_s27, 4 }
  0x14   : > { %s2962_s14 = scalar_select %p152_p9, %s2815_s19, %s154_s12  }
  0x15   : > { %p2964_p12 = por %p165_p11, %p164_p10  ;;  %s200_s16 = sand.u32 1, %s2827_s22  }
  0x16   : > { %s2398_s17 = sshll.u32 %s200_s16, 6  ;;  %s2572_s20 = sshll.u32 %s2839_s25, 10 }
  0x17   : > { %s210_s10 = scalar_lea.hbm %s3627_s0, %s2572_s20  ;;  %s204_s30 = scalar_lea.vmem [#allocation2], %s2398_s17 }
  0x18   : > { %s212_s29 = sshll.u32 %s204_s30, 4  ;;  %p2976_p0 = pnand %p2580_p13, %p2942_p5  ;;  %s213_s29 = int_to_ptr.vmem [resolvable:$true] %s212_s29 }
  0x19   : > { %p2401_p1 = scmp.ge.s32.totalorder %s2847_s27, 1  ;;  %p225_p2 = scmp.lt.s32.totalorder %s2847_s27, 5 }
  0x1a   : > { %s201_s11 = scalar_lea.sflag [#allocation3], %s200_s16  ;;  %p2739_p3 = pneg %p2976_p0 }
  0x1b   : > { %s2750_s12 = scalar_lea.vmem %s213_s29, 1024  ;;  %s2849_s6 = smov [#allocation2]  }
  0x1c   : > { %p2751_p4 = scmp.ne.s32.totalorder %s213_s29, %s2750_s12  ;;  %s2755_s20 = sshll.u32 %s2849_s6, 4  ;;  %s2756_s20 = int_to_ptr.vmem [resolvable:$false] %s2755_s20 }
  0x1d   : > { %s2757_s30 = scalar_lea.vmem %s2756_s20, 2048  ;;  %p2758_p9 = scmp.lt.s32.totalorder %s213_s29, %s2756_s20 }
  0x1e   : > { %p2753_p6 = pnand %p2751_p4, %p2739_p3  ;;  %p2759_p10 = scmp.lt.s32.totalorder %s2757_s30, %s2750_s12 }
  0x20   : > { %p2754_p7 = pneg %p2753_p6  ;;  %p2760_p5 = por %p2759_p10, %p2758_p9 }
  0x22   : > { %p2761_p11 = pnand %p2760_p5, %p2754_p7 }
  0x24   : > { %2764 = shalt.err (!%p2761_p11)
}
  0x25   : > { %2579 = dma.hbm_to_vmem [thread:$0]  (!%p2976_p0), %s210_s10, 1024, %s213_s29, %s201_s11  }
  0x26   : > { %p226_p13 = pnand %p2401_p1, %p225_p2 }
  0x27   : > { %s231_s8 = sand.u32 (!%p226_p13), 1, %s2823_s21  }
  0x28   : > { %229 = sbr.rel (%p226_p13) target bundleno = 568 (0x238), region = 40  ;;  %s2402_s16 = sshll.u32 (!%p226_p13), %s231_s8, 6 }
  0x29   : > { %s232_s17 = scalar_lea.sflag (!%p226_p13), [#allocation3], %s231_s8  ;;  %s2991_s7 = scalar_lea.vmem (!%p226_p13), [#allocation2], %s2402_s16 }
  0x2d   : > { %2806 = dma.done.wait (%p2955_p8), %s232_s17, 1024  }
  0x2e   : > { %2808 = vsyncadd (%p2955_p8), %s232_s17, 4294966272  ;;  %v2850_v0 = vmov 0.0   ;;  %v2851_v1 = vmov 0   ;;  %p267_p0 = scmp.lt.s32.totalorder %s2835_s24, 1  ;;  %v273_v2 = vld [vmem:[%s2991_s7] sm:$0x77] }
  0x2f   : > { %435 = vmatprep.mubr.f32.mxu0 %v2850_v0  ;;  %524 = vmatprep.mubr.f32.mxu1 %v2850_v0  ;;  %vm338_vm0 = vcmask 1042432   ;;  %v274_v3 = vld [vmem:[%s2991_s7 + $0x8] sm:$0x77]  ;;  %v317_v4 = vcombine.high %v273_v2, %v273_v2  ;;  %v275_v6 = vld [vmem:[%s2991_s7 + $0x10] sm:$0x77]  ;;  %v3008_v8 = vld [vmem:[%s3629_s2] sm:$0xff] }
  0x30   : > { %2664 = vset.pattern.permute.xlu1 %v2851_v1  ;;  %2663 = vset.pattern.permute.xlu0 %v2851_v1  ;;  %s268_s29 = scalar_select %p267_p0, %s2835_s24, 1  ;;  %v318_v5 = vcombine.high %v274_v3, %v274_v3  ;;  %v276_v7 = vld [vmem:[%s2991_s7 + $0x18] sm:$0x77]  ;;  %vm325_vm1 = vcmask 23552   ;;  %v319_v9 = vcombine.high %v275_v6, %v275_v6  ;;  %v277_v11 = vld [vmem:[%s2991_s7 + $0x20] sm:$0x77] }
  0x31   : > { %v320_v10 = vcombine.high %v276_v7, %v276_v7  ;;  %2406 = vmatprep.subr.msk.mxu0 %vm338_vm0, %v317_v4  ;;  %v278_v12 = vld [vmem:[%s2991_s7 + $0x28] sm:$0x77]  ;;  %v321_v14 = vcombine.high %v277_v11, %v277_v11  ;;  %v3043_v18 = vld [vmem:[%s3629_s2 + $0x10] sm:$0xff]  ;;  %v3056_v21 = vld [vmem:[%s3629_s2 + $0x18] sm:$0xff]  ;;  %vm1161_vm2 = vcmask 261120   ;;  %s2568_s17 = sshll.u32 (%p2964_p12), %s2835_s24, 6 }
  0x32   : > { %2412 = vmatprep.subr.msk.mxu1 %vm338_vm0, %v318_v5  ;;  %s2573_s28 = sshll.u32 %s268_s29, 5  ;;  %2407 = vmatpush1.msk.msra.mxu0 %vm338_vm0, %v273_v2  ;;  %v3025_v13 = vld [vmem:[%s3629_s2 + $0x8] sm:$0xff]  ;;  %v322_v15 = vcombine.high %v278_v12, %v278_v12  ;;  %v279_v22 = vld [vmem:[%s2991_s7 + $0x30] sm:$0x77]  ;;  %v280_v23 = vld [vmem:[%s2991_s7 + $0x38] sm:$0x77] }
  0x33   : > { %2413 = vmatpush1.msk.msra.mxu1 %vm338_vm0, %v274_v3  ;;  %2408 = vmatmul.mubr.msk.f32.vlgmr.msra.gmra.mxu0 %vm325_vm1, %v3008_v8  ;;  %s271_s30 = scalar_lea.vmem %s3628_s1, %s2573_s28  ;;  %v1150_v24 = vld [vmem:[%s3631_s4 + $0x8] sm:$0x3f]  ;;  %v1149_v25 = vld [vmem:[%s3631_s4] sm:$0xff]  ;;  %v323_v26 = vcombine.high %v279_v22, %v279_v22  ;;  %v324_v27 = vcombine.high %v280_v23, %v280_v23 }
  0x34   : > { %2414 = vmatmul.mubr.msk.f32.vlgmr.msra.gmra.mxu1 %vm325_vm1, %v3008_v8  ;;  %2418 = vmatprep.subr.msk.mxu0 %vm338_vm0, %v319_v9  ;;  %v286_v16 = vld [vmem:[%s271_s30 + $0x8] sm:$0xff]  ;;  %v288_v17 = vld [vmem:[%s271_s30 + $0x18] sm:$0xff]  ;;  %v285_v19 = vld [vmem:[%s271_s30] sm:$0xff] }
  0x35   : > { %2424 = vmatprep.subr.msk.mxu1 %vm338_vm0, %v320_v10  ;;  %2419 = vmatpush1.msk.msra.mxu0 %vm338_vm0, %v275_v6  ;;  %v287_v20 = vld [vmem:[%s271_s30 + $0x10] sm:$0xff]  ;;  %s263_s30 = sand.u32 1, %s2811_s18   ;;  %s2567_s18 = sshll.u32 (%p2964_p12), %s2831_s23, 4 }
  0x36   : > { %2425 = vmatpush1.msk.msra.mxu1 %vm338_vm0, %v276_v7  ;;  %441 = vmatprep.mubr.f32.mxu0 %v2850_v0  ;;  %s2403_s8 = sshll.u32 %s263_s30, 8  ;;  %s2224_s15 = sadd.s32 (%p2964_p12), %s2568_s17, %s2567_s18 }
  0x37   : > { %530 = vmatprep.mubr.f32.mxu1 %v2850_v0  ;;  %2409 = vmatmul.mubr.msk.f32.gmra.mxu0 %vm325_vm1, %v3025_v13  ;;  %s3321_s16 = scalar_lea.vmem [#allocation4], %s2403_s8  ;;  %s2569_s29 = sshll.u32 (%p2964_p12), %s2224_s15, 3 }
  0x38   : > { %2415 = vmatmul.mubr.msk.f32.gmra.mxu1 %vm325_vm1, %v3025_v13  ;;  %447 = vmatprep.mubr.f32.mxu0 %v2850_v0  ;;  %s3540_s28 = scalar_lea.vmem (%p2964_p12), %s3632_s5, %s2569_s29 }
  0x39   : > { %536 = vmatprep.mubr.f32.mxu1 %v2850_v0  ;;  %2430 = vmatprep.subr.msk.mxu0 %vm338_vm0, %v321_v14 }
  0x3a   : > { %2436 = vmatprep.subr.msk.mxu1 %vm338_vm0, %v322_v15  ;;  %296 = vperm.xlu1 %2664, %v286_v16  }
  0x3b   : > { %306 = vperm.xlu0 %2663, %v288_v17   ;;  %2410 = vmatmul.mubr.msk.f32.gmra.mxu0 %vm325_vm1, %v3043_v18 }
  0x3c   : > { %2416 = vmatmul.mubr.msk.f32.gmra.mxu1 %vm325_vm1, %v3043_v18  ;;  %453 = vmatprep.mubr.f32.mxu0 %v2850_v0 }
  0x3d   : > { %542 = vmatprep.mubr.f32.mxu1 %v2850_v0 }
  0x3e   : > { %291 = vperm.xlu1 %2664, %v285_v19  }
  0x3f   : > { %301 = vperm.xlu0 %2663, %v287_v20   ;;  %2411 = vmatmul.mubr.msk.f32.gmra.mxu0 %vm325_vm1, %v3056_v21 }
  0x40   : > { %2417 = vmatmul.mubr.msk.f32.gmra.mxu1 %vm325_vm1, %v3056_v21  ;;  %613 = vmatprep.mubr.f32.mxu0 %v2850_v0 }
  0x41   : > { %702 = vmatprep.mubr.f32.mxu1 %v2850_v0 }
  0x42   : > { %1153 = vperm.xlu1 %2664, %v1149_v25  }
  0x43   : > { %1158 = vperm.xlu0 %2663, %v1150_v24   ;;  %2420 = vmatmul.mubr.msk.f32.vlgmr.msra.gmra.mxu0 %vm325_vm1, %v3008_v8 }
  0x44   : > { %2426 = vmatmul.mubr.msk.f32.vlgmr.msra.gmra.mxu1 %vm325_vm1, %v3008_v8  ;;  %2431 = vmatpush1.msk.msra.mxu0 %vm338_vm0, %v277_v11 }
  0x45   : > { %2437 = vmatpush1.msk.msra.mxu1 %vm338_vm0, %v278_v12  ;;  %619 = vmatprep.mubr.f32.mxu0 %v2850_v0 }
  0x46   : > { %708 = vmatprep.mubr.f32.mxu1 %v2850_v0  ;;  %2442 = vmatprep.subr.msk.mxu0 %vm338_vm0, %v323_v26 }
  0x47   : > { %2448 = vmatprep.subr.msk.mxu1 %vm338_vm0, %v324_v27  ;;  %2421 = vmatmul.mubr.msk.f32.gmra.mxu0 %vm325_vm1, %v3025_v13  ;;  %v3185_v27 = vld [vmem:[%s3630_s3] sm:$0xff] }
  0x48   : > { %2427 = vmatmul.mubr.msk.f32.gmra.mxu1 %vm325_vm1, %v3025_v13  ;;  %625 = vmatprep.mubr.f32.mxu0 %v2850_v0 }
  0x49   : > { %714 = vmatprep.mubr.f32.mxu1 %v2850_v0 }
  0x4b   : > { %2422 = vmatmul.mubr.msk.f32.gmra.mxu0 %vm325_vm1, %v3043_v18 }
  0x4c   : > { %2428 = vmatmul.mubr.msk.f32.gmra.mxu1 %vm325_vm1, %v3043_v18  ;;  %631 = vmatprep.mubr.f32.mxu0 %v2850_v0 }
  0x4d   : > { %720 = vmatprep.mubr.f32.mxu1 %v2850_v0 }
  0x4f   : > { %2423 = vmatmul.mubr.msk.f32.gmra.mxu0 %vm325_vm1, %v3056_v21 }
  0x50   : > { %2429 = vmatmul.mubr.msk.f32.gmra.mxu1 %vm325_vm1, %v3056_v21  ;;  %791 = vmatprep.mubr.f32.mxu0 %v2850_v0 }
  0x51   : > { %880 = vmatprep.mubr.f32.mxu1 %v2850_v0 }
  0x53   : > { %2432 = vmatmul.mubr.msk.f32.vlgmr.msra.gmra.mxu0 %vm325_vm1, %v3008_v8 }
  0x54   : > { %2438 = vmatmul.mubr.msk.f32.vlgmr.msra.gmra.mxu1 %vm325_vm1, %v3008_v8  ;;  %2443 = vmatpush1.msk.msra.mxu0 %vm338_vm0, %v279_v22 }
  0x55   : > { %2449 = vmatpush1.msk.msra.mxu1 %vm338_vm0, %v280_v23  ;;  %797 = vmatprep.mubr.f32.mxu0 %v2850_v0 }
  0x56   : > { %886 = vmatprep.mubr.f32.mxu1 %v2850_v0 }
  0x57   : > { %2433 = vmatmul.mubr.msk.f32.gmra.mxu0 %vm325_vm1, %v3025_v13 }
  0x58   : > { %2439 = vmatmul.mubr.msk.f32.gmra.mxu1 %vm325_vm1, %v3025_v13  ;;  %803 = vmatprep.mubr.f32.mxu0 %v2850_v0 }
  0x59   : > { %892 = vmatprep.mubr.f32.mxu1 %v2850_v0 }
  0x5b   : > { %2434 = vmatmul.mubr.msk.f32.gmra.mxu0 %vm325_vm1, %v3043_v18 }
  0x5c   : > { %2440 = vmatmul.mubr.msk.f32.gmra.mxu1 %vm325_vm1, %v3043_v18  ;;  %809 = vmatprep.mubr.f32.mxu0 %v2850_v0 }
  0x5d   : > { %898 = vmatprep.mubr.f32.mxu1 %v2850_v0 }
  0x5f   : > { %2435 = vmatmul.mubr.msk.f32.gmra.mxu0 %vm325_vm1, %v3056_v21 }
  0x60   : > { %2441 = vmatmul.mubr.msk.f32.gmra.mxu1 %vm325_vm1, %v3056_v21  ;;  %969 = vmatprep.mubr.f32.mxu0 %v2850_v0 }
  0x61   : > { %1058 = vmatprep.mubr.f32.mxu1 %v2850_v0 }
  0x63   : > { %2444 = vmatmul.mubr.msk.f32.vlgmr.msra.gmra.mxu0 %vm325_vm1, %v3008_v8 }
  0x64   : > { %2450 = vmatmul.mubr.msk.f32.vlgmr.msra.gmra.mxu1 %vm325_vm1, %v3008_v8  ;;  %975 = vmatprep.mubr.f32.mxu0 %v2850_v0 }
  0x65   : > { %1064 = vmatprep.mubr.f32.mxu1 %v2850_v0 }
  0x67   : > { %2445 = vmatmul.mubr.msk.f32.gmra.mxu0 %vm325_vm1, %v3025_v13 }
  0x68   : > { %2451 = vmatmul.mubr.msk.f32.gmra.mxu1 %vm325_vm1, %v3025_v13  ;;  %981 = vmatprep.mubr.f32.mxu0 %v2850_v0 }
  0x69   : > { %1070 = vmatprep.mubr.f32.mxu1 %v2850_v0 }
  0x6b   : > { %2446 = vmatmul.mubr.msk.f32.gmra.mxu0 %vm325_vm1, %v3043_v18 }
  0x6c   : > { %2452 = vmatmul.mubr.msk.f32.gmra.mxu1 %vm325_vm1, %v3043_v18  ;;  %987 = vmatprep.mubr.f32.mxu0 %v2850_v0 }
  0x6d   : > { %1076 = vmatprep.mubr.f32.mxu1 %v2850_v0 }
  0x6f   : > { %2447 = vmatmul.mubr.msk.f32.gmra.mxu0 %vm325_vm1, %v3056_v21 }
  0x70   : > { %2453 = vmatmul.mubr.msk.f32.gmra.mxu1 %vm325_vm1, %v3056_v21  ;;  %1232 = vmatprep.mubr.f32.mxu0 %v2850_v0 }
  0x71   : > { %1309 = vmatprep.mubr.f32.mxu1 %v2850_v0 }
  0xb5   : > { %v3152_v41 = vpop.permute.xlu1 %296 }
  0xb6   : > { %v3150_v36 = vpop.permute.xlu0 %306 }
  0xb9   : > { %v3168_v57 = vpop.permute.xlu1 %291 }
  0xba   : > { %v3154_v44 = vpop.permute.xlu0 %301 }
  0xf3   : > { %v437_v28 = vpop.f32.mrf.mxu0 }
  0xf4   : > { %v526_v29 = vpop.f32.mrf.mxu1  ;;  %v438_v9 = vadd.f32 %v437_v28, %v3168_v57 }
  0xf5   : > { %v439_v30 = vpop.f32.mrf.mxu0  ;;  %v527_v10 = vadd.f32 %v526_v29, %v3168_v57 }
  0xf6   : > { %v528_v31 = vpop.f32.mrf.mxu1  ;;  %v440_v5 = vadd.f32 %v439_v30, %v3168_v57  ;;  %v1083_v23 = vmax.f32 %v438_v9, 0.0 }
  0xf7   : > { %v443_v32 = vpop.f32.mrf.mxu0  ;;  %v529_v6 = vadd.f32 %v528_v31, %v3168_v57  ;;  %v1085_v24 = vmax.f32 %v527_v10, 0.0 }
  0xf8   : > { %v532_v33 = vpop.f32.mrf.mxu1  ;;  %v444_v62 = vadd.f32 %v443_v32, %v3152_v41  ;;  %v1084_v21 = vmax.f32 %v440_v5, 0.0  ;;  %v3196_v32 = vld [vmem:[%s3630_s3 + $0x8] sm:$0x3f] }
  0xf9   : > { %v445_v34 = vpop.f32.mrf.mxu0  ;;  %v533_v63 = vadd.f32 %v532_v33, %v3152_v41  ;;  %v1086_v22 = vmax.f32 %v529_v6, 0.0 }
  0xfa   : > { %v534_v35 = vpop.f32.mrf.mxu1  ;;  %v446_v58 = vadd.f32 %v445_v34, %v3152_v41  ;;  %v1099_v17 = vmax.f32 %v444_v62, 0.0 }
  0xfb   : > { %v449_v37 = vpop.f32.mrf.mxu0  ;;  %v535_v59 = vadd.f32 %v534_v35, %v3152_v41  ;;  %v1101_v18 = vmax.f32 %v533_v63, 0.0 }
  0xfc   : > { %v538_v38 = vpop.f32.mrf.mxu1  ;;  %v450_v53 = vadd.f32 %v449_v37, %v3154_v44  ;;  %v1100_v15 = vmax.f32 %v446_v58, 0.0 }
  0xfd   : > { %v451_v39 = vpop.f32.mrf.mxu0  ;;  %v539_v54 = vadd.f32 %v538_v38, %v3154_v44  ;;  %v1102_v16 = vmax.f32 %v535_v59, 0.0 }
  0xfe   : > { %v540_v40 = vpop.f32.mrf.mxu1  ;;  %v452_v49 = vadd.f32 %v451_v39, %v3154_v44  ;;  %v1115_v11 = vmax.f32 %v450_v53, 0.0 }
  0xff   : > { %v455_v42 = vpop.f32.mrf.mxu0  ;;  %v541_v50 = vadd.f32 %v540_v40, %v3154_v44  ;;  %v1117_v12 = vmax.f32 %v539_v54, 0.0 }
 0x100   : > { %v544_v43 = vpop.f32.mrf.mxu1  ;;  %v456_v45 = vadd.f32 %v455_v42, %v3150_v36  ;;  %v1116_v7 = vmax.f32 %v452_v49, 0.0 }
 0x101   : > { %v545_v46 = vadd.f32 %v544_v43, %v3150_v36  ;;  %v457_v47 = vpop.f32.mrf.mxu0  ;;  %v1118_v8 = vmax.f32 %v541_v50, 0.0 }
 0x102   : > { %v546_v48 = vpop.f32.mrf.mxu1  ;;  %v458_v51 = vadd.f32 %v457_v47, %v3150_v36  ;;  %v1131_v1 = vmax.f32 %v456_v45, 0.0 }
 0x103   : > { %v547_v52 = vadd.f32 %v546_v48, %v3150_v36  ;;  %v3164_v55 = vpop.f32.mrf.mxu0  ;;  %v1133_v2 = vmax.f32 %v545_v46, 0.0 }
 0x104   : > { %v3166_v56 = vpop.f32.mrf.mxu1  ;;  %v1132_v60 = vmax.f32 %v458_v51, 0.0 }
 0x105   : > { %v1134_v61 = vmax.f32 %v547_v52, 0.0  ;;  %v3174_v3 = vpop.f32.mrf.mxu0  ;;  %v705_v5 = vadd.f32 %v3166_v56, %v3168_v57 }
 0x106   : > { %v3176_v4 = vpop.f32.mrf.mxu1  ;;  %1192 = vmatprep.subr.mxu0 %v1132_v60 }
 0x107   : > { %1269 = vmatprep.subr.mxu1 %v1134_v61  ;;  %v621_v13 = vpop.f32.mrf.mxu0  ;;  %1193 = vmatpush1.msra.mxu0 %v1131_v1  ;;  %v618_v61 = vadd.f32 %v3174_v3, %v3168_v57  ;;  %v707_v62 = vadd.f32 %v3176_v4, %v3168_v57 }
 0x108   : > { %v710_v14 = vpop.f32.mrf.mxu1  ;;  %1270 = vmatpush1.msra.mxu1 %v1133_v2  ;;  %1194 = vmatprep.subr.mxu0 %v1116_v7  ;;  %v622_v52 = vadd.f32 %v621_v13, %v3152_v41  ;;  %v616_v2 = vadd.f32 %v3164_v55, %v3168_v57 }
 0x109   : > { %1271 = vmatprep.subr.mxu1 %v1118_v8  ;;  %v623_v19 = vpop.f32.mrf.mxu0  ;;  %1195 = vmatpush1.msra.mxu0 %v1115_v11  ;;  %v711_v53 = vadd.f32 %v710_v14, %v3152_v41  ;;  %v1088_v55 = vmax.f32 %v618_v61, 0.0  ;;  %v1090_v14 = vmax.f32 %v707_v62, 0.0 }
 0x10a   : > { %v712_v20 = vpop.f32.mrf.mxu1  ;;  %1272 = vmatpush1.msra.mxu1 %v1117_v12  ;;  %1196 = vmatprep.subr.mxu0 %v1100_v15  ;;  %v624_v48 = vadd.f32 %v623_v19, %v3152_v41  ;;  %v1103_v4 = vmax.f32 %v622_v52, 0.0  ;;  %v1087_v56 = vmax.f32 %v616_v2, 0.0  ;;  %v1089_v15 = vmax.f32 %v705_v5, 0.0 }
 0x10b   : > { %1273 = vmatprep.subr.mxu1 %v1102_v16  ;;  %v627_v25 = vpop.f32.mrf.mxu0  ;;  %1197 = vmatpush1.msra.mxu0 %v1099_v17  ;;  %v713_v49 = vadd.f32 %v712_v20, %v3152_v41  ;;  %v1105_v11 = vmax.f32 %v711_v53, 0.0 }
 0x10c   : > { %v716_v26 = vpop.f32.mrf.mxu1  ;;  %1274 = vmatpush1.msra.mxu1 %v1101_v18  ;;  %1198 = vmatprep.subr.mxu0 %v1084_v21  ;;  %v628_v43 = vadd.f32 %v627_v25, %v3154_v44  ;;  %v1104_v3 = vmax.f32 %v624_v48, 0.0 }
 0x10d   : > { %1275 = vmatprep.subr.mxu1 %v1086_v22  ;;  %v629_v28 = vpop.f32.mrf.mxu0  ;;  %1199 = vmatpush1.msra.mxu0 %v1083_v23  ;;  %v717_v45 = vadd.f32 %v716_v26, %v3154_v44  ;;  %v1106_v10 = vmax.f32 %v713_v49, 0.0 }
 0x10e   : > { %v718_v29 = vpop.f32.mrf.mxu1  ;;  %1276 = vmatpush1.msra.mxu1 %v1085_v24  ;;  %2454 = vmatmul.mubr.msk.f32.vlgmr.msra.gmra.mxu0 %vm1161_vm2, %v3185_v27  ;;  %v630_v33 = vadd.f32 %v629_v28, %v3154_v44  ;;  %v1119_v6 = vmax.f32 %v628_v43, 0.0 }
 0x10f   : > { %2456 = vmatmul.mubr.msk.f32.vlgmr.msra.gmra.mxu1 %vm1161_vm2, %v3185_v27  ;;  %v633_v30 = vpop.f32.mrf.mxu0  ;;  %1238 = vmatprep.mubr.f32.mxu0 %v2850_v0  ;;  %v719_v39 = vadd.f32 %v718_v29, %v3154_v44  ;;  %v1121_v7 = vmax.f32 %v717_v45, 0.0 }
 0x110   : > { %v722_v31 = vpop.f32.mrf.mxu1  ;;  %1315 = vmatprep.mubr.f32.mxu1 %v2850_v0  ;;  %v634_v34 = vadd.f32 %v633_v30, %v3150_v36  ;;  %v1120_v63 = vmax.f32 %v630_v33, 0.0 }
 0x111   : > { %v723_v35 = vadd.f32 %v722_v31, %v3150_v36  ;;  %v635_v37 = vpop.f32.mrf.mxu0  ;;  %v1122_v1 = vmax.f32 %v719_v39, 0.0 }
 0x112   : > { %v724_v38 = vpop.f32.mrf.mxu1  ;;  %v636_v40 = vadd.f32 %v635_v37, %v3150_v36  ;;  %2455 = vmatmul.mubr.msk.f32.gmra.mxu0 %vm1161_vm2, %v3196_v32  ;;  %v1135_v54 = vmax.f32 %v634_v34, 0.0 }
 0x113   : > { %v725_v42 = vadd.f32 %v724_v38, %v3150_v36  ;;  %2457 = vmatmul.mubr.msk.f32.gmra.mxu1 %vm1161_vm2, %v3196_v32  ;;  %v3210_v46 = vpop.f32.mrf.mxu0  ;;  %1386 = vmatprep.mubr.f32.mxu0 %v2850_v0  ;;  %v1137_v58 = vmax.f32 %v723_v35, 0.0 }
 0x114   : > { %v3212_v47 = vpop.f32.mrf.mxu1  ;;  %1463 = vmatprep.mubr.f32.mxu1 %v2850_v0  ;;  %v1136_v50 = vmax.f32 %v636_v40, 0.0 }
 0x115   : > { %v1138_v51 = vmax.f32 %v725_v42, 0.0  ;;  %v3220_v59 = vpop.f32.mrf.mxu0  ;;  %v883_v61 = vadd.f32 %v3212_v47, %v3168_v57 }
 0x116   : > { %v3222_v60 = vpop.f32.mrf.mxu1  ;;  %1346 = vmatprep.subr.mxu0 %v1136_v50 }
 0x117   : > { %1423 = vmatprep.subr.mxu1 %v1138_v51  ;;  %v799_v8 = vpop.f32.mrf.mxu0  ;;  %1347 = vmatpush1.msra.mxu0 %v1135_v54  ;;  %v796_v51 = vadd.f32 %v3220_v59, %v3168_v57  ;;  %v885_v52 = vadd.f32 %v3222_v60, %v3168_v57 }
 0x118   : > { %v888_v9 = vpop.f32.mrf.mxu1  ;;  %1424 = vmatpush1.msra.mxu1 %v1137_v58  ;;  %1348 = vmatprep.subr.mxu0 %v1120_v63  ;;  %v800_v42 = vadd.f32 %v799_v8, %v3152_v41  ;;  %v794_v58 = vadd.f32 %v3210_v46, %v3168_v57 }
 0x119   : > { %1425 = vmatprep.subr.mxu1 %v1122_v1  ;;  %v801_v12 = vpop.f32.mrf.mxu0  ;;  %1349 = vmatpush1.msra.mxu0 %v1119_v6  ;;  %v889_v43 = vadd.f32 %v888_v9, %v3152_v41  ;;  %v1092_v46 = vmax.f32 %v796_v51, 0.0  ;;  %v1094_v9 = vmax.f32 %v885_v52, 0.0 }
 0x11a   : > { %v890_v13 = vpop.f32.mrf.mxu1  ;;  %1426 = vmatpush1.msra.mxu1 %v1121_v7  ;;  %1350 = vmatprep.subr.mxu0 %v1104_v3  ;;  %v802_v37 = vadd.f32 %v801_v12, %v3152_v41  ;;  %v1107_v60 = vmax.f32 %v800_v42, 0.0  ;;  %v1091_v47 = vmax.f32 %v794_v58, 0.0  ;;  %v1093_v3 = vmax.f32 %v883_v61, 0.0  ;;  %v3319_v61 = vpop.permute.xlu0 %1158 }
 0x11b   : > { %1427 = vmatprep.subr.mxu1 %v1106_v10  ;;  %v805_v16 = vpop.f32.mrf.mxu0  ;;  %1351 = vmatpush1.msra.mxu0 %v1103_v4  ;;  %v891_v38 = vadd.f32 %v890_v13, %v3152_v41  ;;  %v1109_v6 = vmax.f32 %v889_v43, 0.0 }
 0x11c   : > { %v894_v17 = vpop.f32.mrf.mxu1  ;;  %1428 = vmatpush1.msra.mxu1 %v1105_v11  ;;  %1352 = vmatprep.subr.mxu0 %v1088_v55  ;;  %v806_v31 = vadd.f32 %v805_v16, %v3154_v44  ;;  %v1108_v59 = vmax.f32 %v802_v37, 0.0 }
 0x11d   : > { %1429 = vmatprep.subr.mxu1 %v1090_v14  ;;  %v807_v18 = vpop.f32.mrf.mxu0  ;;  %1353 = vmatpush1.msra.mxu0 %v1087_v56  ;;  %v895_v33 = vadd.f32 %v894_v17, %v3154_v44  ;;  %v1110_v5 = vmax.f32 %v891_v38, 0.0 }
 0x11e   : > { %v896_v19 = vpop.f32.mrf.mxu1  ;;  %1430 = vmatpush1.msra.mxu1 %v1089_v15  ;;  %2458 = vmatmul.mubr.msk.f32.vlgmr.msra.gmra.mxu0 %vm1161_vm2, %v3185_v27  ;;  %v808_v22 = vadd.f32 %v807_v18, %v3154_v44  ;;  %v1123_v62 = vmax.f32 %v806_v31, 0.0 }
 0x11f   : > { %2460 = vmatmul.mubr.msk.f32.vlgmr.msra.gmra.mxu1 %vm1161_vm2, %v3185_v27  ;;  %v811_v20 = vpop.f32.mrf.mxu0  ;;  %1392 = vmatprep.mubr.f32.mxu0 %v2850_v0  ;;  %v897_v28 = vadd.f32 %v896_v19, %v3154_v44  ;;  %v1125_v63 = vmax.f32 %v895_v33, 0.0 }
 0x120   : > { %v900_v21 = vpop.f32.mrf.mxu1  ;;  %1469 = vmatprep.mubr.f32.mxu1 %v2850_v0  ;;  %v812_v23 = vadd.f32 %v811_v20, %v3150_v36  ;;  %v1124_v53 = vmax.f32 %v808_v22, 0.0 }
 0x121   : > { %v901_v24 = vadd.f32 %v900_v21, %v3150_v36  ;;  %v813_v25 = vpop.f32.mrf.mxu0  ;;  %v1126_v54 = vmax.f32 %v897_v28, 0.0 }
 0x122   : > { %v902_v26 = vpop.f32.mrf.mxu1  ;;  %v814_v29 = vadd.f32 %v813_v25, %v3150_v36  ;;  %2459 = vmatmul.mubr.msk.f32.gmra.mxu0 %vm1161_vm2, %v3196_v32  ;;  %v1139_v45 = vmax.f32 %v812_v23, 0.0 }
 0x123   : > { %v903_v30 = vadd.f32 %v902_v26, %v3150_v36  ;;  %2461 = vmatmul.mubr.msk.f32.gmra.mxu1 %vm1161_vm2, %v3196_v32  ;;  %v3250_v34 = vpop.f32.mrf.mxu0  ;;  %1540 = vmatprep.mubr.f32.mxu0 %v2850_v0  ;;  %v1141_v48 = vmax.f32 %v901_v24, 0.0 }
 0x124   : > { %v3252_v35 = vpop.f32.mrf.mxu1  ;;  %1617 = vmatprep.mubr.f32.mxu1 %v2850_v0  ;;  %v1140_v39 = vmax.f32 %v814_v29, 0.0  ;;  %v972_v38 = vadd.f32 %v3250_v34, %v3168_v57 }
 0x125   : > { %v1142_v40 = vmax.f32 %v903_v30, 0.0  ;;  %v3260_v49 = vpop.f32.mrf.mxu0 }
 0x126   : > { %v3262_v50 = vpop.f32.mrf.mxu1  ;;  %1500 = vmatprep.subr.mxu0 %v1140_v39  ;;  %v974_v31 = vadd.f32 %v3260_v49, %v3168_v57  ;;  %v1061_v39 = vadd.f32 %v3252_v35, %v3168_v57  ;;  %v1095_v34 = vmax.f32 %v972_v38, 0.0 }
 0x127   : > { %1577 = vmatprep.subr.mxu1 %v1142_v40  ;;  %v977_v1 = vpop.f32.mrf.mxu0  ;;  %1501 = vmatpush1.msra.mxu0 %v1139_v45 }
 0x128   : > { %v1066_v2 = vpop.f32.mrf.mxu1  ;;  %1578 = vmatpush1.msra.mxu1 %v1141_v48  ;;  %1502 = vmatprep.subr.mxu0 %v1124_v53  ;;  %v978_v26 = vadd.f32 %v977_v1, %v3152_v41  ;;  %v1096_v49 = vmax.f32 %v974_v31, 0.0  ;;  %v1097_v51 = vmax.f32 %v1061_v39, 0.0 }
 0x129   : > { %1579 = vmatprep.subr.mxu1 %v1126_v54  ;;  %v979_v7 = vpop.f32.mrf.mxu0  ;;  %1503 = vmatpush1.msra.mxu0 %v1123_v62  ;;  %v1067_v28 = vadd.f32 %v1066_v2, %v3152_v41 }
 0x12a   : > { %v1068_v8 = vpop.f32.mrf.mxu1  ;;  %1580 = vmatpush1.msra.mxu1 %v1125_v63  ;;  %1504 = vmatprep.subr.mxu0 %v1108_v59  ;;  %v980_v23 = vadd.f32 %v979_v7, %v3152_v41  ;;  %v1111_v45 = vmax.f32 %v978_v26, 0.0  ;;  %v1976_v26 = vlaneseq }
 0x12b   : > { %1581 = vmatprep.subr.mxu1 %v1110_v5  ;;  %v983_v10 = vpop.f32.mrf.mxu0  ;;  %1505 = vmatpush1.msra.mxu0 %v1107_v60  ;;  %v1069_v24 = vadd.f32 %v1068_v8, %v3152_v41  ;;  %v1113_v48 = vmax.f32 %v1067_v28, 0.0 }
 0x12c   : > { %v1072_v4 = vpop.f32.mrf.mxu1  ;;  %1582 = vmatpush1.msra.mxu1 %v1109_v6  ;;  %1506 = vmatprep.subr.mxu0 %v1092_v46  ;;  %v984_v21 = vadd.f32 %v983_v10, %v3154_v44  ;;  %v1112_v42 = vmax.f32 %v980_v23, 0.0 }
 0x12d   : > { %1583 = vmatprep.subr.mxu1 %v1094_v9  ;;  %v985_v11 = vpop.f32.mrf.mxu0  ;;  %1507 = vmatpush1.msra.mxu0 %v1091_v47  ;;  %v1073_v22 = vadd.f32 %v1072_v4, %v3154_v44  ;;  %v1114_v43 = vmax.f32 %v1069_v24, 0.0 }
 0x12e   : > { %v1074_v12 = vpop.f32.mrf.mxu1  ;;  %1584 = vmatpush1.msra.mxu1 %v1093_v3  ;;  %2462 = vmatmul.mubr.msk.f32.vlgmr.msra.gmra.mxu0 %vm1161_vm2, %v3185_v27  ;;  %v986_v14 = vadd.f32 %v985_v11, %v3154_v44  ;;  %v1127_v40 = vmax.f32 %v984_v21, 0.0 }
 0x12f   : > { %2464 = vmatmul.mubr.msk.f32.vlgmr.msra.gmra.mxu1 %vm1161_vm2, %v3185_v27  ;;  %v989_v13 = vpop.f32.mrf.mxu0  ;;  %1546 = vmatprep.mubr.f32.mxu0 %v2850_v0  ;;  %v1075_v18 = vadd.f32 %v1074_v12, %v3154_v44  ;;  %v1063_v44 = vadd.f32 %v3262_v50, %v3168_v57  ;;  %v1129_v41 = vmax.f32 %v1073_v22, 0.0  ;;  %v3315_v57 = vpop.permute.xlu1 %1153 }
 0x130   : > { %v1078_v55 = vpop.f32.mrf.mxu1  ;;  %1623 = vmatprep.mubr.f32.mxu1 %v2850_v0  ;;  %v990_v56 = vadd.f32 %v989_v13, %v3150_v36  ;;  %v1128_v33 = vmax.f32 %v986_v14, 0.0 }
 0x131   : > { %v1079_v15 = vadd.f32 %v1078_v55, %v3150_v36  ;;  %v991_v16 = vpop.f32.mrf.mxu0  ;;  %v1130_v37 = vmax.f32 %v1075_v18, 0.0  ;;  %v1098_v50 = vmax.f32 %v1063_v44, 0.0 }
 0x132   : > { %v1080_v17 = vpop.f32.mrf.mxu1  ;;  %v992_v19 = vadd.f32 %v991_v16, %v3150_v36  ;;  %2463 = vmatmul.mubr.msk.f32.gmra.mxu0 %vm1161_vm2, %v3196_v32  ;;  %v1143_v29 = vmax.f32 %v990_v56, 0.0 }
 0x133   : > { %v1081_v20 = vadd.f32 %v1080_v17, %v3150_v36  ;;  %2465 = vmatmul.mubr.msk.f32.gmra.mxu1 %vm1161_vm2, %v3196_v32  ;;  %1694 = vmatprep.mubr.f32.mxu0 %v2850_v0  ;;  %v1145_v30 = vmax.f32 %v1079_v15, 0.0 }
 0x134   : > { %1771 = vmatprep.mubr.f32.mxu1 %v2850_v0  ;;  %v1144_v25 = vmax.f32 %v992_v19, 0.0 }
 0x135   : > { %v1146_v36 = vmax.f32 %v1081_v20, 0.0 }
 0x136   : > { %1654 = vmatprep.subr.mxu0 %v1144_v25 }
 0x137   : > { %1731 = vmatprep.subr.mxu1 %v1146_v36  ;;  %1655 = vmatpush1.msra.mxu0 %v1143_v29 }
 0x138   : > { %1732 = vmatpush1.msra.mxu1 %v1145_v30  ;;  %1656 = vmatprep.subr.mxu0 %v1128_v33 }
 0x139   : > { %1733 = vmatprep.subr.mxu1 %v1130_v37  ;;  %1657 = vmatpush1.msra.mxu0 %v1127_v40  ;;  %v1977_v37 = vshrl.u32 %v1976_v26, 7 }
 0x13a   : > { %1734 = vmatpush1.msra.mxu1 %v1129_v41  ;;  %1658 = vmatprep.subr.mxu0 %v1112_v42 }
 0x13b   : > { %1735 = vmatprep.subr.mxu1 %v1114_v43  ;;  %1659 = vmatpush1.msra.mxu0 %v1111_v45  ;;  %v3369_v40 = vadd.s32 8, %v1977_v37 }
 0x13c   : > { %1736 = vmatpush1.msra.mxu1 %v1113_v48  ;;  %1660 = vmatprep.subr.mxu0 %v1096_v49 }
 0x13d   : > { %1737 = vmatprep.subr.mxu1 %v1098_v50  ;;  %1661 = vmatpush1.msra.mxu0 %v1095_v34  ;;  %vm2050_vm3 = vcmp.ge.s32.totalorder %v3369_v40, 11  ;;  %vm2052_vm4 = vcmp.lt.s32.totalorder %v3369_v40, 14  ;;  %vm1982_vm5 = vcmp.lt.s32.totalorder %v3369_v40, 11 }
 0x13e   : > { %1738 = vmatpush1.msra.mxu1 %v1097_v51  ;;  %2466 = vmatmul.mubr.msk.f32.vlgmr.msra.gmra.mxu0 %vm1161_vm2, %v3185_v27  ;;  %vm3391_vm6 = vmand %vm2050_vm3, %vm2052_vm4 }
 0x13f   : > { %2468 = vmatmul.mubr.msk.f32.vlgmr.msra.gmra.mxu1 %vm1161_vm2, %v3185_v27  ;;  %1700 = vmatprep.mubr.f32.mxu0 %v2850_v0 }
 0x140   : > { %1777 = vmatprep.mubr.f32.mxu1 %v2850_v0 }
 0x142   : > { %2467 = vmatmul.mubr.msk.f32.gmra.mxu0 %vm1161_vm2, %v3196_v32 }
 0x143   : > { %2469 = vmatmul.mubr.msk.f32.gmra.mxu1 %vm1161_vm2, %v3196_v32 }
 0x1ce   : > { %v1234_v35 = vpop.f32.mrf.mxu0 }
 0x1cf   : > { %v1311_v52 = vpop.f32.mrf.mxu1  ;;  %v1235_v53 = vadd.f32 %v1234_v35, %v3315_v57 }
 0x1d0   : > { %v1312_v27 = vadd.f32 %v1311_v52, %v3315_v57  ;;  %v1236_v54 = vpop.f32.mrf.mxu0 }
 0x1d1   : > { %v1313_v58 = vpop.f32.mrf.mxu1  ;;  %2183 = vst [vmem:[%s3321_s16] sm:$0xff] %v1235_v53  ;;  %v1237_v0 = vadd.f32 %v1236_v54, %v3315_v57 }
 0x1d2   : > { %2185 = vst [vmem:[%s3321_s16 + $0x10] sm:$0xff] %v1312_v27  ;;  %v1314_v32 = vadd.f32 %v1313_v58, %v3315_v57  ;;  %v1240_v62 = vpop.f32.mrf.mxu0 }
 0x1d3   : > { %v1317_v63 = vpop.f32.mrf.mxu1  ;;  %2184 = vst [vmem:[%s3321_s16 + $0x8] sm:$0xff] %v1237_v0  ;;  %v3330_v1 = vadd.f32 %v1240_v62, %v3319_v61 }
 0x1d4   : > { %2186 = vst [vmem:[%s3321_s16 + $0x18] sm:$0xff] %v1314_v32  ;;  %v3333_v2 = vadd.f32 %v1317_v63, %v3319_v61  ;;  %v1242_v59 = vpop.f32.mrf.mxu0 }
 0x1d5   : > { %v1319_v5 = vpop.f32.mrf.mxu1  ;;  %v2486_v60 = vmul.f32 -1.442695, %v3330_v1  ;;  %v3338_v7 = vadd.f32 %v1242_v59, %v3319_v61 }
 0x1d6   : > { %v2488_v6 = vmul.f32 -1.442695, %v3333_v2  ;;  %v3341_v8 = vadd.f32 %v1319_v5, %v3319_v61 }
 0x1d7   : > { %2673 = vpow2.f32 %v2486_v60  ;;  %v2487_v46 = vmul.f32 -1.442695, %v3338_v7 }
 0x1d8   : > { %v2489_v9 = vmul.f32 -1.442695, %v3341_v8  ;;  %2675 = vpow2.f32 %v2488_v6  ;;  %v2239_v40 = vld [vmem:[%s3321_s16] sm:$0xff] (%p2964_p12) }
 0x1d9   : > { %2677 = vpow2.f32 %v2487_v46  ;;  %2240 = vst [vmem:[%s3540_s28] sm:$0xff] (%p2964_p12), %v2239_v40 }
 0x1da   : > { %2679 = vpow2.f32 %v2489_v9  ;;  %v2241_v63 = vld [vmem:[%s3321_s16 + $0x8] sm:$0xff] (%p2964_p12) }
 0x1db   : > { %2242 = vst [vmem:[%s3540_s28 + $0x8] sm:$0xff] (%p2964_p12), %v2241_v63 }
 0x1de   : > { %v1388_v47 = vpop.f32.mrf.mxu0 }
 0x1df   : > { %v1465_v3 = vpop.f32.mrf.mxu1  ;;  %v1389_v10 = vadd.f32 %v1388_v47, %v3315_v57 }
 0x1e0   : > { %v1466_v4 = vadd.f32 %v1465_v3, %v3315_v57  ;;  %v1390_v11 = vpop.f32.mrf.mxu0 }
 0x1e1   : > { %v1467_v12 = vpop.f32.mrf.mxu1  ;;  %2187 = vst [vmem:[%s3321_s16 + $0x20] sm:$0xff] %v1389_v10  ;;  %v1391_v13 = vadd.f32 %v1390_v11, %v3315_v57 }
 0x1e2   : > { %2189 = vst [vmem:[%s3321_s16 + $0x30] sm:$0xff] %v1466_v4  ;;  %v1468_v55 = vadd.f32 %v1467_v12, %v3315_v57  ;;  %v1394_v14 = vpop.f32.mrf.mxu0 }
 0x1e3   : > { %v1471_v56 = vpop.f32.mrf.mxu1  ;;  %2188 = vst [vmem:[%s3321_s16 + $0x28] sm:$0xff] %v1391_v13  ;;  %v3354_v15 = vadd.f32 %v1394_v14, %v3319_v61 }
 0x1e4   : > { %2190 = vst [vmem:[%s3321_s16 + $0x38] sm:$0xff] %v1468_v55  ;;  %v2674_v16 = vpop.eup %2673  ;;  %v3357_v17 = vadd.f32 %v1471_v56, %v3319_v61  ;;  %v1396_v18 = vpop.f32.mrf.mxu0 }
 0x1e5   : > { %v1473_v19 = vpop.f32.mrf.mxu1  ;;  %v2676_v20 = vpop.eup %2675  ;;  %v1896_v21 = vadd.f32 1.0, %v2674_v16  ;;  %v3360_v22 = vadd.f32 %v1396_v18, %v3319_v61  ;;  %v2490_v29 = vmul.f32 -1.442695, %v3354_v15 }
 0x1e6   : > { %v2678_v23 = vpop.eup %2677  ;;  %v1898_v24 = vadd.f32 1.0, %v2676_v20  ;;  %v3363_v25 = vadd.f32 %v1473_v19, %v3319_v61  ;;  %v2492_v31 = vmul.f32 -1.442695, %v3357_v17 }
 0x1e7   : > { %v2680_v36 = vpop.eup %2679  ;;  %2681 = vrcp.f32 %v1896_v21  ;;  %v1897_v28 = vadd.f32 1.0, %v2678_v23  ;;  %v2491_v44 = vmul.f32 -1.442695, %v3360_v22 }
 0x1e8   : > { %2683 = vrcp.f32 %v1898_v24  ;;  %v1899_v30 = vadd.f32 1.0, %v2680_v36  ;;  %v2493_v33 = vmul.f32 -1.442695, %v3363_v25 }
 0x1e9   : > { %2685 = vrcp.f32 %v1897_v28 }
 0x1ea   : > { %2687 = vrcp.f32 %v1899_v30 }
 0x1eb   : > { %2689 = vpow2.f32 %v2490_v29 }
 0x1ec   : > { %2691 = vpow2.f32 %v2492_v31 }
 0x1ed   : > { %2693 = vpow2.f32 %v2491_v44 }
 0x1ee   : > { %2695 = vpow2.f32 %v2493_v33  ;;  %v1542_v38 = vpop.f32.mrf.mxu0 }
 0x1ef   : > { %v1619_v39 = vpop.f32.mrf.mxu1  ;;  %v1543_v41 = vadd.f32 %v1542_v38, %v3315_v57 }
 0x1f0   : > { %v1620_v42 = vadd.f32 %v1619_v39, %v3315_v57  ;;  %v1544_v43 = vpop.f32.mrf.mxu0 }
 0x1f1   : > { %v1621_v45 = vpop.f32.mrf.mxu1  ;;  %2191 = vst [vmem:[%s3321_s16 + $0x40] sm:$0xff] %v1543_v41  ;;  %v1545_v48 = vadd.f32 %v1544_v43, %v3315_v57 }
 0x1f2   : > { %2193 = vst [vmem:[%s3321_s16 + $0x50] sm:$0xff] %v1620_v42  ;;  %v1622_v49 = vadd.f32 %v1621_v45, %v3315_v57  ;;  %v1548_v50 = vpop.f32.mrf.mxu0 }
 0x1f3   : > { %v1625_v34 = vpop.f32.mrf.mxu1  ;;  %2192 = vst [vmem:[%s3321_s16 + $0x48] sm:$0xff] %v1545_v48  ;;  %v3382_v51 = vadd.f32 %v1548_v50, %v3319_v61 }
 0x1f4   : > { %2194 = vst [vmem:[%s3321_s16 + $0x58] sm:$0xff] %v1622_v49  ;;  %v2682_v35 = vpop.eup %2681  ;;  %v1550_v52 = vpop.f32.mrf.mxu0  ;;  %v3387_v32 = vadd.f32 %v1625_v34, %v3319_v61 }
 0x1f5   : > { %v1627_v53 = vpop.f32.mrf.mxu1  ;;  %v2684_v27 = vpop.eup %2683  ;;  %v2001_v54 = vmul.f32 6.0, %v2682_v35  ;;  %v2071_v58 = vmul.f32 3.545, %v2682_v35  ;;  %v2494_v0 = vmul.f32 -1.442695, %v3382_v51  ;;  %v3396_v60 = vadd.f32 %v1550_v52, %v3319_v61 }
 0x1f6   : > { %v2686_v62 = vpop.eup %2685  ;;  %v2003_v59 = vmul.f32 6.0, %v2684_v27  ;;  %v2073_v5 = vmul.f32 3.545, %v2684_v27  ;;  %v3399_v6 = vadd.f32 %v1627_v53, %v3319_v61 }
 0x1f7   : > { %v2688_v46 = vpop.eup %2687  ;;  %v2518_v9 = vadd.f32 -9.0, %v2001_v54  ;;  %v2550_v47 = vadd.f32 -1.7725, %v2071_v58  ;;  %v2002_v3 = vmul.f32 6.0, %v2686_v62  ;;  %v2072_v10 = vmul.f32 3.545, %v2686_v62 }
 0x1f8   : > { %v2690_v4 = vpop.eup %2689  ;;  %v2520_v11 = vadd.f32 -9.0, %v2003_v59  ;;  %v2552_v12 = vadd.f32 -1.7725, %v2073_v5  ;;  %v2004_v13 = vmul.f32 6.0, %v2688_v46  ;;  %v2074_v55 = vmul.f32 3.545, %v2688_v46 }
 0x1f9   : > { %v2692_v14 = vpop.eup %2691  ;;  %v2135_v56 = vsel %vm3391_vm6, %v2550_v47, %v3330_v1  ;;  %v2519_v16 = vadd.f32 -9.0, %v2002_v3  ;;  %v2551_v18 = vadd.f32 -1.7725, %v2072_v10  ;;  %v1900_v19 = vadd.f32 1.0, %v2690_v4 }
 0x1fa   : > { %v2694_v20 = vpop.eup %2693  ;;  %v2167_v21 = vsel %vm1982_vm5, %v2518_v9, %v2135_v56  ;;  %v2137_v23 = vsel %vm3391_vm6, %v2552_v12, %v3333_v2  ;;  %v2521_v24 = vadd.f32 -9.0, %v2004_v13  ;;  %v2553_v36 = vadd.f32 -1.7725, %v2074_v55 }
 0x1fb   : > { %v2696_v26 = vpop.eup %2695  ;;  %2199 = vst [vmem:[%s3321_s16 + $0x80] sm:$0x3f] %v2167_v21  ;;  %v2169_v1 = vsel %vm1982_vm5, %v2520_v11, %v2137_v23  ;;  %v2136_v28 = vsel %vm3391_vm6, %v2551_v18, %v3338_v7  ;;  %2697 = vrcp.f32 %v1900_v19  ;;  %v1902_v29 = vadd.f32 1.0, %v2692_v14 }
 0x1fc   : > { %2201 = vst [vmem:[%s3321_s16 + $0x90] sm:$0x3f] %v2169_v1  ;;  %v2168_v30 = vsel %vm1982_vm5, %v2519_v16, %v2136_v28  ;;  %v2138_v2 = vsel %vm3391_vm6, %v2553_v36, %v3341_v8  ;;  %v1901_v31 = vadd.f32 1.0, %v2694_v20  ;;  %v1903_v44 = vadd.f32 1.0, %v2696_v26 }
 0x1fd   : > { %2200 = vst [vmem:[%s3321_s16 + $0x88] sm:$0x3f] %v2168_v30  ;;  %v2170_v33 = vsel %vm1982_vm5, %v2521_v24, %v2138_v2  ;;  %2699 = vrcp.f32 %v1902_v29  ;;  %v2496_v7 = vmul.f32 -1.442695, %v3387_v32  ;;  %v2495_v37 = vmul.f32 -1.442695, %v3396_v60 }
 0x1fe   : > { %2202 = vst [vmem:[%s3321_s16 + $0x98] sm:$0x3f] %v2170_v33  ;;  %2701 = vrcp.f32 %v1901_v31  ;;  %v1696_v38 = vpop.f32.mrf.mxu0  ;;  %v2497_v8 = vmul.f32 -1.442695, %v3399_v6 }
 0x1ff   : > { %v1773_v39 = vpop.f32.mrf.mxu1  ;;  %2703 = vrcp.f32 %v1903_v44  ;;  %v1697_v41 = vadd.f32 %v1696_v38, %v3315_v57 }
 0x200   : > { %v1774_v42 = vadd.f32 %v1773_v39, %v3315_v57  ;;  %2705 = vpow2.f32 %v2494_v0  ;;  %v1698_v43 = vpop.f32.mrf.mxu0 }
 0x201   : > { %v1775_v45 = vpop.f32.mrf.mxu1  ;;  %2707 = vpow2.f32 %v2496_v7  ;;  %2195 = vst [vmem:[%s3321_s16 + $0x60] sm:$0xff] %v1697_v41  ;;  %v1699_v48 = vadd.f32 %v1698_v43, %v3315_v57 }
 0x202   : > { %2197 = vst [vmem:[%s3321_s16 + $0x70] sm:$0xff] %v1774_v42  ;;  %v1776_v49 = vadd.f32 %v1775_v45, %v3315_v57  ;;  %2709 = vpow2.f32 %v2495_v37  ;;  %v1702_v50 = vpop.f32.mrf.mxu0 }
 0x203   : > { %v1779_v34 = vpop.f32.mrf.mxu1  ;;  %2711 = vpow2.f32 %v2497_v8  ;;  %2196 = vst [vmem:[%s3321_s16 + $0x68] sm:$0xff] %v1699_v48  ;;  %v3437_v35 = vadd.f32 %v1702_v50, %v3319_v61 }
 0x204   : > { %2198 = vst [vmem:[%s3321_s16 + $0x78] sm:$0xff] %v1776_v49  ;;  %v3440_v52 = vadd.f32 %v1779_v34, %v3319_v61  ;;  %v1704_v53 = vpop.f32.mrf.mxu0 }
 0x205   : > { %v1781_v27 = vpop.f32.mrf.mxu1  ;;  %v2498_v54 = vmul.f32 -1.442695, %v3437_v35  ;;  %v3445_v57 = vadd.f32 %v1704_v53, %v3319_v61 }
 0x206   : > { %v2500_v58 = vmul.f32 -1.442695, %v3440_v52  ;;  %v3448_v0 = vadd.f32 %v1781_v27, %v3319_v61 }
 0x207   : > { %2713 = vpow2.f32 %v2498_v54  ;;  %v2499_v62 = vmul.f32 -1.442695, %v3445_v57 }
 0x208   : > { %v2501_v59 = vmul.f32 -1.442695, %v3448_v0  ;;  %v2698_v5 = vpop.eup %2697  ;;  %2715 = vpow2.f32 %v2500_v58 }
 0x209   : > { %v2005_v46 = vmul.f32 6.0, %v2698_v5  ;;  %v2075_v9 = vmul.f32 3.545, %v2698_v5  ;;  %2717 = vpow2.f32 %v2499_v62 }
 0x20a   : > { %v2700_v47 = vpop.eup %2699  ;;  %2719 = vpow2.f32 %v2501_v59 }
 0x20b   : > { %v2702_v3 = vpop.eup %2701  ;;  %v2522_v10 = vadd.f32 -9.0, %v2005_v46  ;;  %v2554_v4 = vadd.f32 -1.7725, %v2075_v9  ;;  %v2007_v11 = vmul.f32 6.0, %v2700_v47  ;;  %v2077_v12 = vmul.f32 3.545, %v2700_v47 }
 0x20c   : > { %v2704_v61 = vpop.eup %2703  ;;  %v2006_v13 = vmul.f32 6.0, %v2702_v3  ;;  %v2076_v55 = vmul.f32 3.545, %v2702_v3 }
 0x20d   : > { %v2706_v14 = vpop.eup %2705  ;;  %v2139_v56 = vsel %vm3391_vm6, %v2554_v4, %v3354_v15  ;;  %v2524_v16 = vadd.f32 -9.0, %v2007_v11  ;;  %v2556_v18 = vadd.f32 -1.7725, %v2077_v12  ;;  %v2008_v19 = vmul.f32 6.0, %v2704_v61 }
 0x20e   : > { %v2708_v20 = vpop.eup %2707  ;;  %v2171_v21 = vsel %vm1982_vm5, %v2522_v10, %v2139_v56  ;;  %v2523_v23 = vadd.f32 -9.0, %v2006_v13  ;;  %v2555_v24 = vadd.f32 -1.7725, %v2076_v55  ;;  %v2078_v36 = vmul.f32 3.545, %v2704_v61 }
 0x20f   : > { %v2710_v26 = vpop.eup %2709  ;;  %2203 = vst [vmem:[%s3321_s16 + $0xa0] sm:$0x3f] %v2171_v21  ;;  %v2141_v1 = vsel %vm3391_vm6, %v2556_v18, %v3357_v17  ;;  %v2525_v28 = vadd.f32 -9.0, %v2008_v19  ;;  %v1904_v15 = vadd.f32 1.0, %v2706_v14  ;;  %v1906_v29 = vadd.f32 1.0, %v2708_v20 }
 0x210   : > { %v2712_v30 = vpop.eup %2711  ;;  %v2173_v2 = vsel %vm1982_vm5, %v2524_v16, %v2141_v1  ;;  %v2140_v31 = vsel %vm3391_vm6, %v2555_v24, %v3360_v22  ;;  %v2557_v44 = vadd.f32 -1.7725, %v2078_v36  ;;  %v1905_v33 = vadd.f32 1.0, %v2710_v26 }
 0x211   : > { %2205 = vst [vmem:[%s3321_s16 + $0xb0] sm:$0x3f] %v2173_v2  ;;  %v2172_v7 = vsel %vm1982_vm5, %v2523_v23, %v2140_v31  ;;  %2721 = vrcp.f32 %v1904_v15  ;;  %v1907_v17 = vadd.f32 1.0, %v2712_v30 }
 0x212   : > { %2204 = vst [vmem:[%s3321_s16 + $0xa8] sm:$0x3f] %v2172_v7  ;;  %v2142_v37 = vsel %vm3391_vm6, %v2557_v44, %v3363_v25  ;;  %2723 = vrcp.f32 %v1906_v29 }
 0x213   : > { %v2174_v38 = vsel %vm1982_vm5, %v2525_v28, %v2142_v37  ;;  %2725 = vrcp.f32 %v1905_v33 }
 0x214   : > { %v2714_v39 = vpop.eup %2713  ;;  %2206 = vst [vmem:[%s3321_s16 + $0xb8] sm:$0x3f] %v2174_v38  ;;  %2727 = vrcp.f32 %v1907_v17 }
 0x215   : > { %v2716_v22 = vpop.eup %2715  ;;  %v1908_v8 = vadd.f32 1.0, %v2714_v39 }
 0x216   : > { %v2718_v41 = vpop.eup %2717  ;;  %v1910_v42 = vadd.f32 1.0, %v2716_v22 }
 0x217   : > { %v2720_v43 = vpop.eup %2719  ;;  %2729 = vrcp.f32 %v1908_v8  ;;  %v1909_v45 = vadd.f32 1.0, %v2718_v41 }
 0x218   : > { %2731 = vrcp.f32 %v1910_v42  ;;  %v1911_v48 = vadd.f32 1.0, %v2720_v43  ;;  %v2247_v42 = vld [vmem:[%s3321_s16 + $0x20] sm:$0xff] (%p2964_p12)  ;;  %v2249_v43 = vld [vmem:[%s3321_s16 + $0x28] sm:$0xff] (%p2964_p12) }
 0x219   : > { %2733 = vrcp.f32 %v1909_v45  ;;  %v2251_v45 = vld [vmem:[%s3321_s16 + $0x30] sm:$0xff] (%p2964_p12)  ;;  %2248 = vst [vmem:[%s3540_s28 + $0x20] sm:$0xff] (%p2964_p12), %v2247_v42  ;;  %2250 = vst [vmem:[%s3540_s28 + $0x28] sm:$0xff] (%p2964_p12), %v2249_v43 }
 0x21a   : > { %2735 = vrcp.f32 %v1911_v48  ;;  %v2253_v48 = vld [vmem:[%s3321_s16 + $0x38] sm:$0xff] (%p2964_p12)  ;;  %2252 = vst [vmem:[%s3540_s28 + $0x30] sm:$0xff] (%p2964_p12), %v2251_v45 }
 0x21b   : > { %2254 = vst [vmem:[%s3540_s28 + $0x38] sm:$0xff] (%p2964_p12), %v2253_v48 }
 0x21e   : > { %v2722_v25 = vpop.eup %2721 }
 0x21f   : > { %v2724_v49 = vpop.eup %2723  ;;  %v2009_v50 = vmul.f32 6.0, %v2722_v25  ;;  %v2079_v34 = vmul.f32 3.545, %v2722_v25  ;;  %v2255_v25 = vld [vmem:[%s3321_s16 + $0x40] sm:$0xff] (%p2964_p12) }
 0x220   : > { %v2726_v53 = vpop.eup %2725  ;;  %v2011_v27 = vmul.f32 6.0, %v2724_v49  ;;  %v2081_v54 = vmul.f32 3.545, %v2724_v49  ;;  %v2257_v49 = vld [vmem:[%s3321_s16 + $0x48] sm:$0xff] (%p2964_p12)  ;;  %2256 = vst [vmem:[%s3540_s28 + $0x40] sm:$0xff] (%p2964_p12), %v2255_v25 }
 0x221   : > { %v2728_v58 = vpop.eup %2727  ;;  %v2526_v62 = vadd.f32 -9.0, %v2009_v50  ;;  %v2558_v59 = vadd.f32 -1.7725, %v2079_v34  ;;  %v2010_v5 = vmul.f32 6.0, %v2726_v53  ;;  %v2080_v46 = vmul.f32 3.545, %v2726_v53 }
 0x222   : > { %v2528_v9 = vadd.f32 -9.0, %v2011_v27  ;;  %v2560_v47 = vadd.f32 -1.7725, %v2081_v54  ;;  %v2012_v3 = vmul.f32 6.0, %v2728_v58  ;;  %v2082_v10 = vmul.f32 3.545, %v2728_v58 }
 0x223   : > { %v2143_v4 = vsel %vm3391_vm6, %v2558_v59, %v3382_v51  ;;  %v2527_v11 = vadd.f32 -9.0, %v2010_v5  ;;  %v2559_v12 = vadd.f32 -1.7725, %v2080_v46  ;;  %v2259_v50 = vld [vmem:[%s3321_s16 + $0x50] sm:$0xff] (%p2964_p12)  ;;  %v2261_v34 = vld [vmem:[%s3321_s16 + $0x58] sm:$0xff] (%p2964_p12)  ;;  %2258 = vst [vmem:[%s3540_s28 + $0x48] sm:$0xff] (%p2964_p12), %v2257_v49 }
 0x224   : > { %v2730_v61 = vpop.eup %2729  ;;  %v2175_v13 = vsel %vm1982_vm5, %v2526_v62, %v2143_v4  ;;  %v2145_v55 = vsel %vm3391_vm6, %v2560_v47, %v3387_v32  ;;  %v2529_v14 = vadd.f32 -9.0, %v2012_v3  ;;  %v2561_v56 = vadd.f32 -1.7725, %v2082_v10  ;;  %2260 = vst [vmem:[%s3540_s28 + $0x50] sm:$0xff] (%p2964_p12), %v2259_v50  ;;  %2262 = vst [vmem:[%s3540_s28 + $0x58] sm:$0xff] (%p2964_p12), %v2261_v34  ;;  %v2263_v53 = vld [vmem:[%s3321_s16 + $0x60] sm:$0xff] (%p2964_p12) }
 0x225   : > { %v2732_v16 = vpop.eup %2731  ;;  %2207 = vst [vmem:[%s3321_s16 + $0xc0] sm:$0x3f] %v2175_v13  ;;  %v2177_v18 = vsel %vm1982_vm5, %v2528_v9, %v2145_v55  ;;  %v2144_v51 = vsel %vm3391_vm6, %v2559_v12, %v3396_v60  ;;  %v2013_v19 = vmul.f32 6.0, %v2730_v61  ;;  %v2083_v20 = vmul.f32 3.545, %v2730_v61  ;;  %v2265_v27 = vld [vmem:[%s3321_s16 + $0x68] sm:$0xff] (%p2964_p12) }
 0x226   : > { %v2734_v21 = vpop.eup %2733  ;;  %2209 = vst [vmem:[%s3321_s16 + $0xd0] sm:$0x3f] %v2177_v18  ;;  %v2176_v32 = vsel %vm1982_vm5, %v2527_v11, %v2144_v51  ;;  %v2146_v23 = vsel %vm3391_vm6, %v2561_v56, %v3399_v6  ;;  %v2015_v24 = vmul.f32 6.0, %v2732_v16  ;;  %v2085_v36 = vmul.f32 3.545, %v2732_v16  ;;  %v2267_v54 = vld [vmem:[%s3321_s16 + $0x70] sm:$0xff] (%p2964_p12) }
 0x227   : > { %v2736_v26 = vpop.eup %2735  ;;  %2208 = vst [vmem:[%s3321_s16 + $0xc8] sm:$0x3f] %v2176_v32  ;;  %v2178_v1 = vsel %vm1982_vm5, %v2529_v14, %v2146_v23  ;;  %v2530_v60 = vadd.f32 -9.0, %v2013_v19  ;;  %v2562_v28 = vadd.f32 -1.7725, %v2083_v20  ;;  %v2014_v15 = vmul.f32 6.0, %v2734_v21 }
 0x228   : > { %2210 = vst [vmem:[%s3321_s16 + $0xd8] sm:$0x3f] %v2178_v1  ;;  %v2532_v29 = vadd.f32 -9.0, %v2015_v24  ;;  %v2564_v30 = vadd.f32 -1.7725, %v2085_v36  ;;  %v2016_v31 = vmul.f32 6.0, %v2736_v26 }
 0x229   : > { %v2084_v2 = vmul.f32 3.545, %v2734_v21  ;;  %v2147_v6 = vsel %vm3391_vm6, %v2562_v28, %v3437_v35  ;;  %v2531_v44 = vadd.f32 -9.0, %v2014_v15  ;;  %v2086_v33 = vmul.f32 3.545, %v2736_v26  ;;  %2264 = vst [vmem:[%s3540_s28 + $0x60] sm:$0xff] (%p2964_p12), %v2263_v53 }
 0x22a   : > { %v2179_v7 = vsel %vm1982_vm5, %v2530_v60, %v2147_v6  ;;  %v2149_v17 = vsel %vm3391_vm6, %v2564_v30, %v3440_v52  ;;  %v2533_v38 = vadd.f32 -9.0, %v2016_v31  ;;  %2266 = vst [vmem:[%s3540_s28 + $0x68] sm:$0xff] (%p2964_p12), %v2265_v27  ;;  %2268 = vst [vmem:[%s3540_s28 + $0x70] sm:$0xff] (%p2964_p12), %v2267_v54  ;;  %v2269_v58 = vld [vmem:[%s3321_s16 + $0x78] sm:$0xff] (%p2964_p12)  ;;  %v2271_v62 = vld [vmem:[%s3321_s16 + $0x80] sm:$0xff] (%p2964_p12) }
 0x22b   : > { %v2563_v37 = vadd.f32 -1.7725, %v2084_v2  ;;  %2211 = vst [vmem:[%s3321_s16 + $0xe0] sm:$0x3f] %v2179_v7  ;;  %v2181_v39 = vsel %vm1982_vm5, %v2532_v29, %v2149_v17  ;;  %v2565_v22 = vadd.f32 -1.7725, %v2086_v33 }
 0x22c   : > { %2213 = vst [vmem:[%s3321_s16 + $0xf0] sm:$0x3f] %v2181_v39  ;;  %2221 = sbr.rel (!%p2964_p12) target bundleno = 568 (0x238), region = 48  ;;  %v2273_v59 = vld [vmem:[%s3321_s16 + $0x88] sm:$0xff] (%p2964_p12)  ;;  %2270 = vst [vmem:[%s3540_s28 + $0x78] sm:$0xff] (%p2964_p12), %v2269_v58  ;;  %v2275_v5 = vld [vmem:[%s3321_s16 + $0x90] sm:$0xff] (%p2964_p12) }
 0x22d   : > { %v2148_v35 = vsel %vm3391_vm6, %v2563_v37, %v3445_v57  ;;  %v2150_v41 = vsel %vm3391_vm6, %v2565_v22, %v3448_v0  ;;  %v2243_v57 = vld [vmem:[%s3321_s16 + $0x10] sm:$0xff] (%p2964_p12)  ;;  %v2245_v0 = vld [vmem:[%s3321_s16 + $0x18] sm:$0xff] (%p2964_p12)  ;;  %2272 = vst [vmem:[%s3540_s28 + $0x100] sm:$0xff] (%p2964_p12), %v2271_v62  ;;  %2274 = vst [vmem:[%s3540_s28 + $0x108] sm:$0xff] (%p2964_p12), %v2273_v59 }
 0x22e   : > { %v2180_v8 = vsel %vm1982_vm5, %v2531_v44, %v2148_v35  ;;  %v2182_v52 = vsel %vm1982_vm5, %v2533_v38, %v2150_v41  ;;  %2244 = vst [vmem:[%s3540_s28 + $0x10] sm:$0xff] (%p2964_p12), %v2243_v57  ;;  %2246 = vst [vmem:[%s3540_s28 + $0x18] sm:$0xff] (%p2964_p12), %v2245_v0  ;;  %v2277_v46 = vld [vmem:[%s3321_s16 + $0x98] sm:$0xff] (%p2964_p12)  ;;  %v2279_v9 = vld [vmem:[%s3321_s16 + $0xa0] sm:$0xff] (%p2964_p12) }
 0x22f   : > { %2212 = vst [vmem:[%s3321_s16 + $0xe8] sm:$0x3f] %v2180_v8  ;;  %2214 = vst [vmem:[%s3321_s16 + $0xf8] sm:$0x3f] %v2182_v52  ;;  %v2281_v47 = vld [vmem:[%s3321_s16 + $0xa8] sm:$0xff] (%p2964_p12)  ;;  %v2283_v3 = vld [vmem:[%s3321_s16 + $0xb0] sm:$0xff] (%p2964_p12) }
 0x230   : > { %2276 = vst [vmem:[%s3540_s28 + $0x110] sm:$0xff] (%p2964_p12), %v2275_v5  ;;  %2278 = vst [vmem:[%s3540_s28 + $0x118] sm:$0xff] (%p2964_p12), %v2277_v46  ;;  %v2285_v10 = vld [vmem:[%s3321_s16 + $0xb8] sm:$0xff] (%p2964_p12)  ;;  %v2287_v4 = vld [vmem:[%s3321_s16 + $0xc0] sm:$0xff] (%p2964_p12) }
 0x231   : > { %2280 = vst [vmem:[%s3540_s28 + $0x120] sm:$0xff] %v2279_v9  ;;  %2282 = vst [vmem:[%s3540_s28 + $0x128] sm:$0xff] %v2281_v47  ;;  %v2289_v11 = vld [vmem:[%s3321_s16 + $0xc8] sm:$0xff]  ;;  %v2291_v12 = vld [vmem:[%s3321_s16 + $0xd0] sm:$0xff] }
 0x232   : > { %2284 = vst [vmem:[%s3540_s28 + $0x130] sm:$0xff] %v2283_v3  ;;  %2286 = vst [vmem:[%s3540_s28 + $0x138] sm:$0xff] %v2285_v10  ;;  %v2293_v61 = vld [vmem:[%s3321_s16 + $0xd8] sm:$0xff]  ;;  %v2295_v13 = vld [vmem:[%s3321_s16 + $0xe0] sm:$0xff] }
 0x233   : > { %2288 = vst [vmem:[%s3540_s28 + $0x140] sm:$0xff] %v2287_v4  ;;  %2290 = vst [vmem:[%s3540_s28 + $0x148] sm:$0xff] %v2289_v11  ;;  %v2299_v14 = vld [vmem:[%s3321_s16 + $0xf0] sm:$0xff] }
 0x234   : > { %2292 = vst [vmem:[%s3540_s28 + $0x150] sm:$0xff] %v2291_v12  ;;  %2294 = vst [vmem:[%s3540_s28 + $0x158] sm:$0xff] %v2293_v61 }
 0x235   : > { %2296 = vst [vmem:[%s3540_s28 + $0x160] sm:$0xff] %v2295_v13  ;;  %2300 = vst [vmem:[%s3540_s28 + $0x170] sm:$0xff] %v2299_v14 }
 0x236   : > { %v2297_v55 = vld [vmem:[%s3321_s16 + $0xe8] sm:$0xff]  ;;  %v2301_v56 = vld [vmem:[%s3321_s16 + $0xf8] sm:$0xff] }
 0x237   : > { %2298 = vst [vmem:[%s3540_s28 + $0x168] sm:$0xff] %v2297_v55  ;;  %2302 = vst [vmem:[%s3540_s28 + $0x178] sm:$0xff] %v2301_v56 }
 0x238 PF: > { %s18_s27 = sadd.s32 1, %s2847_s27   ;;  %s3643_s11 = sld [smem:[#allocation6_spill]] }
 0x239   : > { %p15_p8 = scmp.ge.s32.totalorder %s18_s27, 6   ;;  %s3644_s7 = sld [smem:[#allocation7_spill]] }
 0x23a   : > { %s3645_s18 = smov %s2815_s19  ;;  %s3646_s19 = smov %s2962_s14 }
 0x23b   : > { %s3647_s20 = smov %s2823_s21  ;;  %s3648_s21 = smov %s2827_s22 }
 0x23c   : > { %s3649_s22 = smov %s2950_s9  ;;  %s3650_s23 = smov %s2839_s25 }
 0x23d   : > { %s3651_s24 = smov %s2843_s26  ;;  %17 = sbr.rel (!%p15_p8) target bundleno = 6 (0x6), region = 106 }
 0x23e   : > { %s3652_s25 = smov %s3643_s11 }
 0x23f   : > { %s3653_s26 = smov %s3644_s7 }
 0x242   :  { %2318 = vsyncpa [#allocation3], 1 }
 0x243   :  { %2320 = vsyncpa [#allocation3 + $0x1], 1 }

</bundles_post_ra>
